<compile_context>
chip_gen: v7x
topology: tpu7x:2x2x1
jax: 0.10.0
libtpu: 0.0.40
codegen_flags: <defaults>
</compile_context>

<pallas_src>
import jax
import jax.numpy as jnp
from jax import lax
from jax.experimental import pallas as pl
from jax.experimental.pallas import tpu as pltpu

# ---- SplAtConv2d configuration (matches nn module defaults: radix=2, bias=True,
#      groups=2 (cardinality), no norm_layer, dropblock_prob=0, stride=1) ----
B = 2
IN_CH = 8
CHANNELS = 8           # `channels` arg
RADIX = 2
CARD = 2               # `groups` arg (cardinality)
KH = KW = 3
H = W = 16
PAD = 1
REDUCTION = 4
G1 = CARD * RADIX                                   # main conv groups
COUT1 = CHANNELS * RADIX                            # main conv out channels
INTER = max(IN_CH * RADIX // REDUCTION, 32)         # fc1 out channels
CPC = CHANNELS // CARD                              # channels per cardinality group
HW = H * W
KDIM = KH * KW * IN_CH                              # im2col contraction dim (72)
KPAD = 128                                          # contraction dim padded to a full lane tile


def splat_kernel(cols_ref, w_ref, b_ref, f1w_ref, f1b_ref, f2w_ref, f2b_ref, out_ref):
    # cols_ref: (1, KPAD, HW)      im2col'd input (K zero-padded to 128, HW lane-dense)
    # w_ref:    (COUT1, KPAD)      densified grouped-conv weight, transposed + K-padded
    # b_ref:    (COUT1, 1)
    # f1w_ref:  (INTER, CHANNELS), f1b_ref: (INTER, 1)
    # f2w_ref:  (COUT1, INTER)     rows pre-permuted to (radix, channel) order
    # f2b_ref:  (COUT1, 1)         same permutation
    # out_ref:  (1, CHANNELS, HW)  -> reshapes to NCHW in the wrapper

    # --- grouped 3x3 conv (zero-masked dense weight) + bias + ReLU: ONE matmul ---
    yT = jnp.dot(w_ref[...], cols_ref[0],
                 preferred_element_type=jnp.float32) + b_ref[...]
    yT = jnp.maximum(yT, 0.0)                                    # (COUT1, HW)

    # --- per-radix sum + global average pool (single lane reduction) ---
    s = yT[0:CHANNELS, :]
    for r in range(1, RADIX):
        s = s + yT[r * CHANNELS:(r + 1) * CHANNELS, :]
    gap = jnp.sum(s, axis=-1, keepdims=True) * (1.0 / float(HW))  # (CHANNELS, 1)

    # --- fc1 -> ReLU -> fc2 (grouped 1x1 convs as small dense matmuls) ---
    h1 = jnp.maximum(
        jnp.dot(f1w_ref[...], gap, preferred_element_type=jnp.float32)
        + f1b_ref[...], 0.0)                                     # (INTER, 1)
    logits = (jnp.dot(f2w_ref[...], h1, preferred_element_type=jnp.float32)
              + f2b_ref[...])                                    # (COUT1, 1), (radix, ch) order

    # --- rSoftMax over the radix axis (rows pre-permuted, aligned 8-row slices) ---
    # TODO(synk): PyTorch uses sigmoid when radix == 1; only the radix > 1 path exists.
    lr = [logits[r * CHANNELS:(r + 1) * CHANNELS, :] for r in range(RADIX)]
    m = lr[0]
    for r in range(1, RADIX):
        m = jnp.maximum(m, lr[r])
    es = [jnp.exp(l - m) for l in lr]
    denom = es[0]
    for r in range(1, RADIX):
        denom = denom + es[r]
    inv = pl.reciprocal(denom, approx=False)                     # exact

    # --- out = sum_r att_r * split_r : one vectorized pass, one bulk store ---
    out = (es[0] * inv) * yT[0:CHANNELS, :]
    for r in range(1, RADIX):
        out = out + (es[r] * inv) * yT[r * CHANNELS:(r + 1) * CHANNELS, :]
    out_ref[0] = out.astype(out_ref.dtype)                       # (CHANNELS, HW)


@jax.jit
def splat_conv2d(x_nchw, w_t, b_col, f1w_t, f1b_col, f2w_t, f2b_col):
    # Wrapper-side im2col directly in NCHW (no transposes; fuses with the pad).
    x_pad = jnp.pad(x_nchw, ((0, 0), (0, 0), (PAD, PAD), (PAD, PAD)))
    patches = [x_pad[:, :, kh:kh + H, kw:kw + W].reshape(B, IN_CH, HW)
               for kh in range(KH) for kw in range(KW)]
    colsT = jnp.concatenate(patches, axis=1)                     # (B, KDIM, HW)
    colsT = jnp.pad(colsT, ((0, 0), (0, KPAD - KDIM), (0, 0)))   # (B, 128, 256)

    out = pl.pallas_call(
        splat_kernel,
        out_shape=jax.ShapeDtypeStruct((B, CHANNELS, HW), jnp.float32),
        grid=(B,),
        in_specs=[
            pl.BlockSpec((1, KPAD, HW), lambda b: (b, 0, 0)),
            pl.BlockSpec((COUT1, KPAD), lambda b: (0, 0)),
            pl.BlockSpec((COUT1, 1), lambda b: (0, 0)),
            pl.BlockSpec((INTER, CHANNELS), lambda b: (0, 0)),
            pl.BlockSpec((INTER, 1), lambda b: (0, 0)),
            pl.BlockSpec((COUT1, INTER), lambda b: (0, 0)),
            pl.BlockSpec((COUT1, 1), lambda b: (0, 0)),
        ],
        out_specs=pl.BlockSpec((1, CHANNELS, HW), lambda b: (b, 0, 0)),
        compiler_params=pltpu.CompilerParams(dimension_semantics=("parallel",)),
    )(colsT, w_t, b_col, f1w_t, f1b_col, f2w_t, f2b_col)
    return out.reshape(B, CHANNELS, H, W)                        # already NCHW


# ---------- plain-JAX glue: densify grouped weights (zeros across groups) ----------
def densify_conv(w, groups):
    # w: (Cout, Cin/groups, KH, KW) -> im2col weight (KH*KW*Cin, Cout), (kh,kw,cin)-major
    cout, cin_g, kh, kw = w.shape
    cin = cin_g * groups
    out_g = cout // groups
    dense = jnp.zeros((kh, kw, cin, cout), w.dtype)
    for o in range(cout):
        g = o // out_g
        dense = dense.at[:, :, g * cin_g:(g + 1) * cin_g, o].set(
            jnp.transpose(w[o], (1, 2, 0)))
    return dense.reshape(kh * kw * cin, cout)


def densify_1x1(w, groups):
    # w: (Cout, Cin/groups, 1, 1) -> dense (Cin, Cout)
    cout, cin_g = w.shape[0], w.shape[1]
    cin = cin_g * groups
    out_g = cout // groups
    dense = jnp.zeros((cin, cout), w.dtype)
    for o in range(cout):
        g = o // out_g
        dense = dense.at[g * cin_g:(g + 1) * cin_g, o].set(w[o, :, 0, 0])
    return dense


# ---------- pure-JAX reference (mirrors the PyTorch forward) ----------
def reference(x_nchw, conv_w, conv_b, f1w_d, f1b, f2w_d, f2b):
    y = lax.conv_general_dilated(
        x_nchw, conv_w, window_strides=(1, 1), padding=((PAD, PAD), (PAD, PAD)),
        dimension_numbers=('NCHW', 'OIHW', 'NCHW'), feature_group_count=G1)
    y = jnp.maximum(y + conv_b[None, :, None, None], 0.0)
    splits = [y[:, r * CHANNELS:(r + 1) * CHANNELS] for r in range(RADIX)]
    gap = sum(splits).mean(axis=(2, 3))                          # (B, CHANNELS)
    h1 = jnp.maximum(gap @ f1w_d + f1b, 0.0)
    logits = h1 @ f2w_d + f2b                                    # (B, COUT1)
    a = logits.reshape(B, CARD, RADIX, CPC).transpose(0, 2, 1, 3)
    a = jax.nn.softmax(a, axis=1).reshape(B, RADIX * CHANNELS)
    atts = [a[:, r * CHANNELS:(r + 1) * CHANNELS] for r in range(RADIX)]
    return sum(att[:, :, None, None] * sp for att, sp in zip(atts, splits))


if __name__ == "__main__":
    key = jax.random.PRNGKey(0)
    ks = jax.random.split(key, 7)
    x = jax.random.normal(ks[0], (B, IN_CH, H, W), jnp.float32)
    conv_w = jax.random.normal(ks[1], (COUT1, IN_CH // G1, KH, KW), jnp.float32) * 0.1
    conv_b = jax.random.normal(ks[2], (COUT1,), jnp.float32) * 0.1
    fc1_w = jax.random.normal(ks[3], (INTER, CHANNELS // CARD, 1, 1), jnp.float32) * 0.1
    fc1_b = jax.random.normal(ks[4], (INTER,), jnp.float32) * 0.1
    fc2_w = jax.random.normal(ks[5], (COUT1, INTER // CARD, 1, 1), jnp.float32) * 0.1
    fc2_b = jax.random.normal(ks[6], (COUT1,), jnp.float32) * 0.1

    conv_w_dense = densify_conv(conv_w, G1)                      # (72, 16)
    f1w_d = densify_1x1(fc1_w, CARD)                             # (8, 32)
    f2w_d = densify_1x1(fc2_w, CARD)                             # (32, 16)

    # --- kernel-side weight prep: transpose, K-pad, rsoftmax row-permute ---
    w_t = jnp.pad(conv_w_dense.T, ((0, 0), (0, KPAD - KDIM)))    # (16, 128)
    b_col = conv_b.reshape(COUT1, 1)
    f1w_t = f1w_d.T                                              # (32, 8)
    f1b_col = fc1_b.reshape(INTER, 1)
    # new row (r*CHANNELS + c*CPC + cc) <- old fc2 output channel (c*RADIX*CPC + r*CPC + cc)
    perm = jnp.array([c * RADIX * CPC + r * CPC + cc
                      for r in range(RADIX) for c in range(CARD) for cc in range(CPC)],
                     dtype=jnp.int32)
    f2w_t = f2w_d.T[perm, :]                                     # (16, 32)
    f2b_col = fc2_b[perm].reshape(COUT1, 1)

    out = splat_conv2d(x, w_t, b_col, f1w_t, f1b_col, f2w_t, f2b_col)
    out = jax.block_until_ready(out)

    ref = reference(x, conv_w, conv_b, f1w_d, fc1_b, f2w_d, fc2_b)
    assert out.shape == (B, CHANNELS, H, W)
    assert jnp.allclose(out, ref, atol=1e-4, rtol=1e-4), \
        float(jnp.max(jnp.abs(out - ref)))
    print("KERNEL_OK")
</pallas_src>

<mosaic_0001>
module attributes {stable_mosaic.version = 11 : i64} {
  func.func @splat_kernel(%arg0: i32, %arg1: memref<1x128x256xf32, #tpu.memory_space<vmem>>, %arg2: memref<16x128xf32, #tpu.memory_space<vmem>>, %arg3: memref<16x1xf32, #tpu.memory_space<vmem>>, %arg4: memref<32x8xf32, #tpu.memory_space<vmem>>, %arg5: memref<32x1xf32, #tpu.memory_space<vmem>>, %arg6: memref<16x32xf32, #tpu.memory_space<vmem>>, %arg7: memref<16x1xf32, #tpu.memory_space<vmem>>, %arg8: memref<1x8x256xf32, #tpu.memory_space<vmem>>) attributes {dimension_semantics = [#tpu.dimension_semantics<parallel>], iteration_bounds = array<i64: 2>, scalar_prefetch = 0 : i64, scratch_operands = 0 : i64, tpu.core_type = #tpu.core_type<tc>, window_params = [{transform_indices = @transform_0, window_bounds = array<i64: 1, 128, 256>}, {pipeline_mode = #tpu.pipeline_mode<synchronous>, transform_indices = @transform_1, window_bounds = array<i64: 16, 128>}, {pipeline_mode = #tpu.pipeline_mode<synchronous>, transform_indices = @transform_2, window_bounds = array<i64: 16, 1>}, {pipeline_mode = #tpu.pipeline_mode<synchronous>, transform_indices = @transform_3, window_bounds = array<i64: 32, 8>}, {pipeline_mode = #tpu.pipeline_mode<synchronous>, transform_indices = @transform_4, window_bounds = array<i64: 32, 1>}, {pipeline_mode = #tpu.pipeline_mode<synchronous>, transform_indices = @transform_5, window_bounds = array<i64: 16, 32>}, {pipeline_mode = #tpu.pipeline_mode<synchronous>, transform_indices = @transform_6, window_bounds = array<i64: 16, 1>}, {transform_indices = @transform_7, window_bounds = array<i64: 1, 8, 256>}]} {
    %c0 = arith.constant 0 : index
    %c0_0 = arith.constant 0 : index
    %0 = vector.load %arg2[%c0, %c0_0] : memref<16x128xf32, #tpu.memory_space<vmem>>, vector<16x128xf32>
    %c0_1 = arith.constant 0 : index
    %c0_2 = arith.constant 0 : index
    %c0_3 = arith.constant 0 : index
    %1 = vector.load %arg1[%c0_1, %c0_2, %c0_3] : memref<1x128x256xf32, #tpu.memory_space<vmem>>, vector<1x128x256xf32>
    %2 = vector.shape_cast %1 : vector<1x128x256xf32> to vector<128x256xf32>
    %cst = arith.constant dense<0.000000e+00> : vector<16x256xf32>
    %3 = tpu.matmul %0, %2, %cst {dimension_numbers = #tpu.dot_dimension_numbers<[1], [0], [0], [1], [0, 0, 1, 1], [], []>} : vector<16x128xf32>, vector<128x256xf32>, vector<16x256xf32> -> vector<16x256xf32>
    %c0_4 = arith.constant 0 : index
    %c0_5 = arith.constant 0 : index
    %4 = vector.load %arg3[%c0_4, %c0_5] : memref<16x1xf32, #tpu.memory_space<vmem>>, vector<16x1xf32>
    %5 = vector.broadcast %4 : vector<16x1xf32> to vector<16x256xf32>
    %6 = arith.addf %3, %5 : vector<16x256xf32>
    %cst_6 = arith.constant 0.000000e+00 : f32
    %7 = vector.broadcast %cst_6 : f32 to vector<16x256xf32>
    %8 = arith.maximumf %6, %7 : vector<16x256xf32>
    %9 = vector.extract_strided_slice %8 {offsets = [0, 0], sizes = [8, 256], strides = [1, 1]} : vector<16x256xf32> to vector<8x256xf32>
    %10 = vector.extract_strided_slice %8 {offsets = [8, 0], sizes = [8, 256], strides = [1, 1]} : vector<16x256xf32> to vector<8x256xf32>
    %11 = arith.addf %9, %10 : vector<8x256xf32>
    %cst_7 = arith.constant dense<0.000000e+00> : vector<8xf32>
    %12 = vector.multi_reduction <add>, %11, %cst_7 [1] : vector<8x256xf32> to vector<8xf32>
    %13 = vector.shape_cast %12 : vector<8xf32> to vector<8x1xf32>
    %cst_8 = arith.constant 3.906250e-03 : f32
    %14 = vector.broadcast %cst_8 : f32 to vector<8x1xf32>
    %15 = arith.mulf %13, %14 : vector<8x1xf32>
    %c0_9 = arith.constant 0 : index
    %c0_10 = arith.constant 0 : index
    %16 = vector.load %arg4[%c0_9, %c0_10] : memref<32x8xf32, #tpu.memory_space<vmem>>, vector<32x8xf32>
    %cst_11 = arith.constant dense<0.000000e+00> : vector<32x1xf32>
    %17 = tpu.matmul %16, %15, %cst_11 {dimension_numbers = #tpu.dot_dimension_numbers<[1], [0], [0], [1], [0, 0, 1, 1], [], []>} : vector<32x8xf32>, vector<8x1xf32>, vector<32x1xf32> -> vector<32x1xf32>
    %c0_12 = arith.constant 0 : index
    %c0_13 = arith.constant 0 : index
    %18 = vector.load %arg5[%c0_12, %c0_13] : memref<32x1xf32, #tpu.memory_space<vmem>>, vector<32x1xf32>
    %19 = arith.addf %17, %18 : vector<32x1xf32>
    %cst_14 = arith.constant 0.000000e+00 : f32
    %20 = vector.broadcast %cst_14 : f32 to vector<32x1xf32>
    %21 = arith.maximumf %19, %20 : vector<32x1xf32>
    %c0_15 = arith.constant 0 : index
    %c0_16 = arith.constant 0 : index
    %22 = vector.load %arg6[%c0_15, %c0_16] : memref<16x32xf32, #tpu.memory_space<vmem>>, vector<16x32xf32>
    %cst_17 = arith.constant dense<0.000000e+00> : vector<16x1xf32>
    %23 = tpu.matmul %22, %21, %cst_17 {dimension_numbers = #tpu.dot_dimension_numbers<[1], [0], [0], [1], [0, 0, 1, 1], [], []>} : vector<16x32xf32>, vector<32x1xf32>, vector<16x1xf32> -> vector<16x1xf32>
    %c0_18 = arith.constant 0 : index
    %c0_19 = arith.constant 0 : index
    %24 = vector.load %arg7[%c0_18, %c0_19] : memref<16x1xf32, #tpu.memory_space<vmem>>, vector<16x1xf32>
    %25 = arith.addf %23, %24 : vector<16x1xf32>
    %26 = vector.extract_strided_slice %25 {offsets = [0, 0], sizes = [8, 1], strides = [1, 1]} : vector<16x1xf32> to vector<8x1xf32>
    %27 = vector.extract_strided_slice %25 {offsets = [8, 0], sizes = [8, 1], strides = [1, 1]} : vector<16x1xf32> to vector<8x1xf32>
    %28 = arith.maximumf %26, %27 : vector<8x1xf32>
    %29 = arith.subf %26, %28 : vector<8x1xf32>
    %30 = math.exp %29 : vector<8x1xf32>
    %31 = arith.subf %27, %28 : vector<8x1xf32>
    %32 = math.exp %31 : vector<8x1xf32>
    %33 = arith.addf %30, %32 : vector<8x1xf32>
    %34 = tpu.reciprocal %33 : vector<8x1xf32> -> vector<8x1xf32>
    %35 = arith.mulf %30, %34 : vector<8x1xf32>
    %36 = vector.extract_strided_slice %8 {offsets = [0, 0], sizes = [8, 256], strides = [1, 1]} : vector<16x256xf32> to vector<8x256xf32>
    %37 = vector.broadcast %35 : vector<8x1xf32> to vector<8x256xf32>
    %38 = arith.mulf %37, %36 : vector<8x256xf32>
    %39 = arith.mulf %32, %34 : vector<8x1xf32>
    %40 = vector.extract_strided_slice %8 {offsets = [8, 0], sizes = [8, 256], strides = [1, 1]} : vector<16x256xf32> to vector<8x256xf32>
    %41 = vector.broadcast %39 : vector<8x1xf32> to vector<8x256xf32>
    %42 = arith.mulf %41, %40 : vector<8x256xf32>
    %43 = arith.addf %38, %42 : vector<8x256xf32>
    %c0_20 = arith.constant 0 : index
    %c0_21 = arith.constant 0 : index
    %c0_22 = arith.constant 0 : index
    %44 = vector.load %arg8[%c0_20, %c0_21, %c0_22] : memref<1x8x256xf32, #tpu.memory_space<vmem>>, vector<1x8x256xf32>
    %45 = vector.shape_cast %44 : vector<1x8x256xf32> to vector<8x256xf32>
    %46 = vector.shape_cast %43 : vector<8x256xf32> to vector<1x8x256xf32>
    tpu.vector_store %arg8[%c0_20, %c0_21, %c0_22], %46 {strides = array<i32>} : memref<1x8x256xf32, #tpu.memory_space<vmem>>, vector<1x8x256xf32>,
    return
  }
  func.func @transform_0(%arg0: i32) -> (i32, i32, i32) {
    %c0_i32 = arith.constant 0 : i32
    %c0_i32_0 = arith.constant 0 : i32
    %c0_i32_1 = arith.constant 0 : i32
    return %arg0, %c0_i32, %c0_i32_0 : i32, i32, i32
  }
  func.func @transform_1(%arg0: i32) -> (i32, i32) {
    %c0_i32 = arith.constant 0 : i32
    %c0_i32_0 = arith.constant 0 : i32
    %c0_i32_1 = arith.constant 0 : i32
    return %c0_i32, %c0_i32_0 : i32, i32
  }
  func.func @transform_2(%arg0: i32) -> (i32, i32) {
    %c0_i32 = arith.constant 0 : i32
    %c0_i32_0 = arith.constant 0 : i32
    %c0_i32_1 = arith.constant 0 : i32
    return %c0_i32, %c0_i32_0 : i32, i32
  }
  func.func @transform_3(%arg0: i32) -> (i32, i32) {
    %c0_i32 = arith.constant 0 : i32
    %c0_i32_0 = arith.constant 0 : i32
    %c0_i32_1 = arith.constant 0 : i32
    return %c0_i32, %c0_i32_0 : i32, i32
  }
  func.func @transform_4(%arg0: i32) -> (i32, i32) {
    %c0_i32 = arith.constant 0 : i32
    %c0_i32_0 = arith.constant 0 : i32
    %c0_i32_1 = arith.constant 0 : i32
    return %c0_i32, %c0_i32_0 : i32, i32
  }
  func.func @transform_5(%arg0: i32) -> (i32, i32) {
    %c0_i32 = arith.constant 0 : i32
    %c0_i32_0 = arith.constant 0 : i32
    %c0_i32_1 = arith.constant 0 : i32
    return %c0_i32, %c0_i32_0 : i32, i32
  }
  func.func @transform_6(%arg0: i32) -> (i32, i32) {
    %c0_i32 = arith.constant 0 : i32
    %c0_i32_0 = arith.constant 0 : i32
    %c0_i32_1 = arith.constant 0 : i32
    return %c0_i32, %c0_i32_0 : i32, i32
  }
  func.func @transform_7(%arg0: i32) -> (i32, i32, i32) {
    %c0_i32 = arith.constant 0 : i32
    %c0_i32_0 = arith.constant 0 : i32
    %c0_i32_1 = arith.constant 0 : i32
    return %arg0, %c0_i32, %c0_i32_0 : i32, i32, i32
  }
}

</mosaic_0001>

<bundles_post_ra>
// kernel: splat_conv2d.1
= control target key start
LH: loop header
LB: loop body
LE: loop exit
PB: predicated region body
PF: predicated region fallthrough
CT: control target
= control target key end

     0   :  { %s849_s24 = smov 0   ;;  %s984_s0 = inlined_call_operand.vmem [shape: f32[2,128,256], index: 0, kind: input, shape index: {}]   ;;  %s985_s1 = inlined_call_operand.vmem [shape: f32[16,128], index: 1, kind: input, shape index: {}]   ;;  %s986_s2 = inlined_call_operand.vmem [shape: f32[16,1], index: 2, kind: input, shape index: {}]   ;;  %s987_s3 = inlined_call_operand.vmem [shape: f32[32,8], index: 3, kind: input, shape index: {}]   ;;  %s988_s4 = inlined_call_operand.vmem [shape: f32[32,1], index: 4, kind: input, shape index: {}]   ;;  %s989_s5 = inlined_call_operand.vmem [shape: f32[16,32], index: 5, kind: input, shape index: {}]   ;;  %s990_s6 = inlined_call_operand.vmem [shape: f32[16,1], index: 6, kind: input, shape index: {}]   ;;  %s991_s7 = inlined_call_operand.vmem [shape: f32[2,8,256], index: 7, kind: output, shape index: {}]  }
   0x1 LB: > { %s692_s25 = sadd.s32 4294967295, %s805_s24   ;;  %p696_p0 = scmp.ge.s32.totalorder %s805_s24, 1  ;;  %s805_s24 = sphi %s849_s24, %s17_s24  }
   0x2   : > { %p237_p1 = scmp.lt.s32.totalorder %s805_s24, 3 }
   0x4   : > { %p238_p2 = pnand %p696_p0, %p237_p1 }
   0x5   : > { %p269_p3 = scmp.lt.s32.totalorder (!%p238_p2), %s692_s25, 1  ;;  %v313_v0 = vld [vmem:[%s986_s2] sm:$0xff] (!%p238_p2)  ;;  %v807_v1 = vmov (!%p238_p2), 0.0   ;;  %v808_v2 = vmov (!%p238_p2), 0   ;;  %v314_v3 = vld [vmem:[%s986_s2 + $0x8] sm:$0xff] (!%p238_p2)  ;;  %vm420_vm0 = vcmask (!%p238_p2), 64512  }
   0x6   : > { %241 = sbr.rel (%p238_p2) target bundleno = 1030 (0x406), region = 48  ;;  %389 = vmatprep.mubr.f32.mxu0 (!%p238_p2), %v807_v1  ;;  %791 = vset.pattern.permute.xlu0 (!%p238_p2), %v808_v2  ;;  %v279_v52 = vld [vmem:[%s985_s1] sm:$0xff] (!%p238_p2)  ;;  %v280_v53 = vld [vmem:[%s985_s1 + $0x8] sm:$0xff] (!%p238_p2)  ;;  %vm526_vm1 = vcmask (!%p238_p2), 261120  }
   0x7   : > { %317 = vperm.xlu0 (!%p238_p2), %791, %v313_v0   ;;  %792 = vset.pattern.permute.xlu1 (!%p238_p2), %v808_v2 }
   0xb   : > { %322 = vperm.xlu0 (!%p238_p2), %791, %v314_v3  }
   0xd   : > { %s993_s25 = smov (!%p269_p3, %s692_s25), 1 }
   0xe   : > { %s709_s30 = sshll.u32 %s993_s25, 8  ;;  %s710_s18 = sshll.u32 %s993_s25, 4 }
   0xf   : > { %s870_s10 = scalar_lea.vmem %s984_s0, %s709_s30  ;;  %s278_s21 = scalar_lea.vmem %s991_s7, %s710_s18 }
  0x10   : > { %v282_v4 = vld [vmem:[%s870_s10 + $0x8] sm:$0xff]  ;;  %v284_v5 = vld [vmem:[%s870_s10 + $0x18] sm:$0xff]  ;;  %v281_v6 = vld [vmem:[%s870_s10] sm:$0xff] }
  0x11   : > { %v741_v7 = vpack.c.bf16 %v284_v5, %v282_v4  ;;  %v283_v8 = vld [vmem:[%s870_s10 + $0x10] sm:$0xff]  ;;  %v286_v9 = vld [vmem:[%s870_s10 + $0x28] sm:$0xff]  ;;  %v288_v10 = vld [vmem:[%s870_s10 + $0x38] sm:$0xff] }
  0x12   : > { %v743_v11 = vpack.c.bf16 %v283_v8, %v281_v6  ;;  %v745_v12 = vpack.c.bf16 %v288_v10, %v286_v9  ;;  %v285_v13 = vld [vmem:[%s870_s10 + $0x20] sm:$0xff]  ;;  %v287_v14 = vld [vmem:[%s870_s10 + $0x30] sm:$0xff]  ;;  %v290_v15 = vld [vmem:[%s870_s10 + $0x48] sm:$0xff] }
  0x13   : > { %742 = vmatprep.subr.bf16.mxu0 %v741_v7  ;;  %v292_v16 = vld [vmem:[%s870_s10 + $0x58] sm:$0xff]  ;;  %v747_v17 = vpack.c.bf16 %v287_v14, %v285_v13  ;;  %v289_v19 = vld [vmem:[%s870_s10 + $0x40] sm:$0xff]  ;;  %v291_v20 = vld [vmem:[%s870_s10 + $0x50] sm:$0xff] }
  0x14   : > { %744 = vmatpush1.bf16.msra.mxu0 %v743_v11  ;;  %v749_v18 = vpack.c.bf16 %v292_v16, %v290_v15  ;;  %v294_v21 = vld [vmem:[%s870_s10 + $0x68] sm:$0xff]  ;;  %v296_v22 = vld [vmem:[%s870_s10 + $0x78] sm:$0xff]  ;;  %v751_v23 = vpack.c.bf16 %v291_v20, %v289_v19  ;;  %v293_v25 = vld [vmem:[%s870_s10 + $0x60] sm:$0xff] }
  0x15   : > { %746 = vmatprep.subr.bf16.mxu0 %v745_v12  ;;  %v753_v24 = vpack.c.bf16 %v296_v22, %v294_v21  ;;  %v295_v26 = vld [vmem:[%s870_s10 + $0x70] sm:$0xff]  ;;  %v298_v27 = vld [vmem:[%s870_s10 + $0x88] sm:$0xff]  ;;  %v300_v28 = vld [vmem:[%s870_s10 + $0x98] sm:$0xff] }
  0x16   : > { %v755_v29 = vpack.c.bf16 %v295_v26, %v293_v25  ;;  %v757_v30 = vpack.c.bf16 %v300_v28, %v298_v27  ;;  %v297_v31 = vld [vmem:[%s870_s10 + $0x80] sm:$0xff]  ;;  %v299_v32 = vld [vmem:[%s870_s10 + $0x90] sm:$0xff]  ;;  %v302_v33 = vld [vmem:[%s870_s10 + $0xa8] sm:$0xff] }
  0x17   : > { %v304_v34 = vld [vmem:[%s870_s10 + $0xb8] sm:$0xff]  ;;  %v759_v35 = vpack.c.bf16 %v299_v32, %v297_v31  ;;  %v301_v37 = vld [vmem:[%s870_s10 + $0xa0] sm:$0xff]  ;;  %v303_v38 = vld [vmem:[%s870_s10 + $0xb0] sm:$0xff] }
  0x18   : > { %748 = vmatpush1.bf16.msra.mxu0 %v747_v17  ;;  %v761_v36 = vpack.c.bf16 %v304_v34, %v302_v33  ;;  %v306_v39 = vld [vmem:[%s870_s10 + $0xc8] sm:$0xff]  ;;  %v308_v40 = vld [vmem:[%s870_s10 + $0xd8] sm:$0xff]  ;;  %v763_v41 = vpack.c.bf16 %v303_v38, %v301_v37  ;;  %v305_v43 = vld [vmem:[%s870_s10 + $0xc0] sm:$0xff] }
  0x19   : > { %750 = vmatprep.subr.bf16.mxu0 %v749_v18  ;;  %v765_v42 = vpack.c.bf16 %v308_v40, %v306_v39  ;;  %v307_v44 = vld [vmem:[%s870_s10 + $0xd0] sm:$0xff]  ;;  %v310_v45 = vld [vmem:[%s870_s10 + $0xe8] sm:$0xff]  ;;  %v312_v46 = vld [vmem:[%s870_s10 + $0xf8] sm:$0xff] }
  0x1a   : > { %v767_v47 = vpack.c.bf16 %v307_v44, %v305_v43  ;;  %v769_v48 = vpack.c.bf16 %v312_v46, %v310_v45  ;;  %v309_v49 = vld [vmem:[%s870_s10 + $0xe0] sm:$0xff]  ;;  %v311_v50 = vld [vmem:[%s870_s10 + $0xf0] sm:$0xff]  ;;  %v413_v10 = vld [vmem:[%s987_s3 + $0x8] sm:$0xff] }
  0x1b   : > { %v771_v51 = vpack.c.bf16 %v311_v50, %v309_v49  ;;  %v412_v7 = vld [vmem:[%s987_s3] sm:$0xff]  ;;  %v414_v11 = vld [vmem:[%s987_s3 + $0x10] sm:$0xff]  ;;  %v415_v12 = vld [vmem:[%s987_s3 + $0x18] sm:$0xff] }
  0x1c   : > { %752 = vmatpush1.bf16.msra.mxu0 %v751_v23  ;;  %724 = vmatprep.mubr.msk.f32.mxu1 %vm420_vm0, %v412_v7  ;;  %v522_v13 = vld [vmem:[%s989_s5] sm:$0xff]  ;;  %v417_v14 = vld [vmem:[%s988_s4 + $0x8] sm:$0xff]  ;;  %v419_v20 = vld [vmem:[%s988_s4 + $0x18] sm:$0xff] }
  0x1d   : > { %754 = vmatprep.subr.bf16.mxu0 %v753_v24  ;;  %v416_v15 = vld [vmem:[%s988_s4] sm:$0xff]  ;;  %v418_v22 = vld [vmem:[%s988_s4 + $0x10] sm:$0xff]  ;;  %v523_v32 = vld [vmem:[%s989_s5 + $0x8] sm:$0xff] }
  0x1e   : > { %v525_v33 = vld [vmem:[%s990_s6 + $0x8] sm:$0xff]  ;;  %v524_v34 = vld [vmem:[%s990_s6] sm:$0xff] }
  0x20   : > { %756 = vmatpush1.bf16.msra.mxu0 %v755_v29 }
  0x21   : > { %758 = vmatprep.subr.bf16.mxu0 %v757_v30 }
  0x24   : > { %760 = vmatpush1.bf16.msra.mxu0 %v759_v35 }
  0x25   : > { %762 = vmatprep.subr.bf16.mxu0 %v761_v36 }
  0x28   : > { %764 = vmatpush1.bf16.msra.mxu0 %v763_v41 }
  0x29   : > { %766 = vmatprep.subr.bf16.mxu0 %v765_v42 }
  0x2c   : > { %768 = vmatpush1.bf16.msra.mxu0 %v767_v47 }
  0x2d   : > { %770 = vmatprep.subr.bf16.mxu0 %v769_v48 }
  0x30   : > { %772 = vmatpush1.bf16.msra.mxu0 %v771_v51 }
  0x33   : > { %390 = vmatmul.mubr.f32.vlgmr.msra.gmra.mrb[0].mxu0 %v279_v52 }
  0x34   : > { %395 = vmatprep.mubr.f32.mxu0 %v807_v1 }
  0x37   : > { %396 = vmatmul.mubr.f32.gmra.mrb[2].mxu0 %v280_v53 }
  0x86   : > { %v318_v54 = vpop.permute.xlu0 %317 }
  0x8a   : > { %v323_v58 = vpop.permute.xlu0 %322 }
 0x106   : > { %v391_v55 = vpop.f32.mrb[0].mxu0 }
 0x107   : > { %v393_v56 = vpop.f32.mrb[1].mxu0  ;;  %v911_v57 = vadd.f32 %v391_v55, %v318_v54 }
 0x108   : > { %v913_v59 = vadd.f32 %v393_v56, %v318_v54 }
 0x109   : > { %v402_v0 = vmax.f32 %v911_v57, 0.0 }
 0x10a   : > { %v397_v60 = vpop.f32.mrb[2].mxu0  ;;  %v403_v2 = vmax.f32 %v913_v59, 0.0 }
 0x10b   : > { %v915_v61 = vadd.f32 %v397_v60, %v323_v58  ;;  %v399_v62 = vpop.f32.mrb[3].mxu0 }
 0x10c   : > { %v917_v63 = vadd.f32 %v399_v62, %v323_v58 }
 0x10d   : > { %v404_v1 = vmax.f32 %v915_v61, 0.0 }
 0x10e   : > { %v405_v3 = vmax.f32 %v917_v63, 0.0 }
 0x10f   : > { %v406_v4 = vadd.f32 %v404_v1, %v402_v0 }
 0x110   : > { %v407_v5 = vadd.f32 %v405_v3, %v403_v2 }
 0x112   : > { %v408_v6 = vadd.f32 %v407_v5, %v406_v4 }
 0x114   : > { %409 = vadd.xlane.f32.xlu1 %v408_v6 }
 0x1a1   : > { %v410_v8 = vpop.xlane.xlu1 %409 }
 0x1a2   : > { %v411_v9 = vmul.f32 0.00390625, %v410_v8 }
 0x1a4   : > { %722 = vmatprep.subr.mxu1 %v411_v9 }
 0x1a5   : > { %723 = vmatpush3.msra.mxu1 %v411_v9 }
 0x1a6   : > { %725 = vmatmul.mubr.msk.f32.vlgmr.msra.gmra.mrb[0].mxu1 %vm420_vm0, %v413_v10 }
 0x1a7   : > { %727 = vmatprep.mubr.msk.f32.mxu1 %vm420_vm0, %v414_v11 }
 0x1aa   : > { %728 = vmatmul.mubr.msk.f32.gmra.mrb[2].mxu1 %vm420_vm0, %v415_v12 }
 0x1ab   : > { %738 = vmatprep.mubr.msk.f32.mxu1 %vm526_vm1, %v522_v13 }
 0x279   : > { %v726_v16 = vpop.f32.mrb[0].mxu1 }
 0x27a   : > { %v505_v17 = vadd.f32 %v726_v16, %v417_v14  ;;  %v499_v18 = vpop.f32.mrb[1].mxu1 }
 0x27b   : > { %v500_v19 = vadd.f32 %v499_v18, %v416_v15 }
 0x27c   : > { %v519_v21 = vmax.f32 %v505_v17, 0.0 }
 0x27d   : > { %v518_v23 = vmax.f32 %v500_v19, 0.0  ;;  %v729_v24 = vpop.f32.mrb[2].mxu1 }
 0x27e   : > { %v515_v25 = vadd.f32 %v729_v24, %v419_v20  ;;  %v509_v26 = vpop.f32.mrb[3].mxu1 }
 0x27f   : > { %v773_v27 = vpack.c.bf16 %v519_v21, %v518_v23  ;;  %v510_v28 = vadd.f32 %v509_v26, %v418_v22 }
 0x280   : > { %v521_v29 = vmax.f32 %v515_v25, 0.0 }
 0x281   : > { %v520_v30 = vmax.f32 %v510_v28, 0.0  ;;  %774 = vmatprep.subr.bf16.mxu1 %v773_v27 }
 0x282   : > { %776 = vmatpush3.bf16.msra.mxu1 %v773_v27 }
 0x283   : > { %v777_v31 = vpack.c.bf16 %v521_v29, %v520_v30 }
 0x285   : > { %778 = vmatprep.subr.bf16.mxu1 %v777_v31 }
 0x286   : > { %780 = vmatpush3.bf16.msra.mxu1 %v777_v31 }
 0x289   : > { %739 = vmatmul.mubr.msk.f32.vlgmr.msra.gmra.mrb[4].mxu1 %vm526_vm1, %v523_v32 }
 0x35c   : > { %v740_v35 = vpop.f32.mrb[4].mxu1 }
 0x35d   : > { %v605_v36 = vadd.f32 %v740_v35, %v525_v33  ;;  %v599_v37 = vpop.f32.mrb[5].mxu1 }
 0x35e   : > { %v600_v38 = vadd.f32 %v599_v37, %v524_v34 }
 0x360   : > { %v608_v39 = vmax.f32 %v600_v38, %v605_v36 }
 0x362   : > { %v609_v40 = vsub.f32 %v600_v38, %v608_v39  ;;  %v612_v41 = vsub.f32 %v605_v36, %v608_v39 }
 0x364   : > { %v610_v42 = vmul.f32 1.442695, %v609_v40  ;;  %v613_v43 = vmul.f32 1.442695, %v612_v41 }
 0x366   : > { %793 = vpow2.f32 %v610_v42 }
 0x367   : > { %795 = vpow2.f32 %v613_v43 }
 0x370   : > { %v794_v44 = vpop.eup %793 }
 0x371   : > { %v796_v45 = vpop.eup %795 }
 0x372   : > { %v615_v46 = vadd.f32 %v796_v45, %v794_v44 }
 0x374   : > { %797 = vrcp.f32 %v615_v46 }
 0x37e   : > { %v798_v47 = vpop.eup %797 }
 0x37f   : > { %v625_v48 = vmul.f32 %v798_v47, %v796_v45  ;;  %v617_v49 = vmul.f32 %v798_v47, %v794_v44 }
 0x381   : > { %628 = vperm.xlu0 %791, %v625_v48   ;;  %620 = vperm.xlu1 %792, %v617_v49  }
 0x400   : > { %v629_v50 = vpop.permute.xlu0 %628  ;;  %v621_v51 = vpop.permute.xlu1 %620 }
 0x401   : > { %v631_v52 = vmul.f32 %v629_v50, %v404_v1  ;;  %v632_v53 = vmul.f32 %v629_v50, %v405_v3  ;;  %v623_v54 = vmul.f32 %v621_v51, %v402_v0  ;;  %v624_v55 = vmul.f32 %v621_v51, %v403_v2 }
 0x403   : > { %v633_v56 = vadd.f32 %v631_v52, %v623_v54  ;;  %v634_v58 = vadd.f32 %v632_v53, %v624_v55 }
 0x405   : > { %635 = vst [vmem:[%s278_s21] sm:$0xff] %v633_v56  ;;  %636 = vst [vmem:[%s278_s21 + $0x8] sm:$0xff] %v634_v58 }
 0x406 PF: > { %s17_s24 = sadd.s32 1, %s805_s24  }
 0x407   : > { %p14_p4 = scmp.ge.s32.totalorder %s17_s24, 4  }
 0x409   :  { %16 = sbr.rel (!%p14_p4) target bundleno = 1 (0x1), region = 78 }

</bundles_post_ra>
